<compile_context>
chip_gen: v6e
topology: v6e:2x2x1
jax: 0.10.0
libtpu: 0.0.40
codegen_flags: <defaults>
</compile_context>

<pallas_src>
import jax
import jax.numpy as jnp
from jax.experimental import pallas as pl
from jax.experimental.pallas import tpu as pltpu


def mlp_kernel(x_ref, w1_ref, b1_ref, w2_ref, b2_ref, o_ref):
    # hidden = relu(x @ W1 + b1)  -- bf16 operands, f32 MXU accumulate
    h = jnp.dot(x_ref[...], w1_ref[...], preferred_element_type=jnp.float32)
    h = jnp.maximum(h + b1_ref[...], 0.0)            # bias + ReLU on the VPU, f32
    # out = hidden @ W2 + b2  -- direct (tb, 10) result, no lane padding
    o = jnp.dot(h.astype(w2_ref.dtype), w2_ref[...],
                preferred_element_type=jnp.float32)
    o_ref[...] = (o + b2_ref[...]).astype(o_ref.dtype)


def prepare_params(w1, b1, w2, b2, *, use_bf16=True):
    """One-time weight prep (hoisted out of the per-call path)."""
    cdt = jnp.bfloat16 if use_bf16 else w1.dtype
    return (w1.astype(cdt), b1.astype(jnp.float32),
            w2.astype(cdt), b2.astype(jnp.float32))


def _round_up(x, m):
    return ((x + m - 1) // m) * m


_MIN_ROWS_PER_CORE = 512  # don't split tiles smaller than this per v7x TensorCore


def _pick_batch_tile(B, block_b):
    """Returns (tile_rows, num_tiles, padded_batch)."""
    if B <= block_b:
        if B >= 2 * _MIN_ROWS_PER_CORE:
            # Mid-size batch: split into (at least) two tiles so both v7x
            # TensorCores get work under dimension_semantics=("parallel",).
            tb = _round_up(-(-B // 2), 8)
        else:
            # Small batch: single grid step, block == full batch dims (legal).
            return B, 1, B
    else:
        tb = block_b
    nb = -(-B // tb)
    return tb, nb, nb * tb


def mlp_forward(x, w1c, b1f, w2c, b2f, *, block_b=2048):
    """Pallas MLP forward. Weights must already be prepped via prepare_params()."""
    B, IN = x.shape
    H = w1c.shape[1]
    OUT = w2c.shape[1]

    xc = x.astype(w1c.dtype)

    tb, nb, Bp = _pick_batch_tile(B, block_b)
    if Bp != B:
        # Only hit for unaligned large batches; small batches use tb == B.
        # TODO(synk): handle the ragged last tile in-kernel (scalar row-count +
        # masked rows) to avoid this extra pass over x.
        xc = jnp.pad(xc, ((0, Bp - B), (0, 0)))

    itemsize = lambda a: a.size * a.dtype.itemsize
    cost = pl.CostEstimate(
        flops=2 * Bp * (IN * H + H * OUT),
        transcendentals=0,
        bytes_accessed=(itemsize(xc) + itemsize(w1c) + itemsize(b1f)
                        + itemsize(w2c) + itemsize(b2f)
                        + Bp * OUT * jnp.dtype(x.dtype).itemsize),
    )

    out = pl.pallas_call(
        mlp_kernel,
        out_shape=jax.ShapeDtypeStruct((Bp, OUT), x.dtype),
        grid=(nb,),
        in_specs=[
            pl.BlockSpec((tb, IN), lambda i: (i, 0)),     # batch tile of x
            pl.BlockSpec((IN, H), lambda i: (0, 0)),      # W1, VMEM-resident
            pl.BlockSpec((1, H), lambda i: (0, 0)),       # b1, VMEM-resident
            pl.BlockSpec((H, OUT), lambda i: (0, 0)),     # W2, VMEM-resident
            pl.BlockSpec((1, OUT), lambda i: (0, 0)),     # b2, VMEM-resident
        ],
        out_specs=pl.BlockSpec((tb, OUT), lambda i: (i, 0)),
        compiler_params=pltpu.CompilerParams(
            dimension_semantics=("parallel",),            # v7x: 2 TCs split batch
        ),
        cost_estimate=cost,
    )(xc, w1c, b1f, w2c, b2f)

    return out if Bp == B else out[:B]


def mlp_forward_auto(x, w1c, b1f, w2c, b2f, *, block_b=2048, tiny_batch=0):
    """Optional dispatcher: for B <= tiny_batch use plain XLA (latency-bound
    regime where pallas_call fixed cost dominates); otherwise Pallas."""
    if x.shape[0] <= tiny_batch:
        h = jnp.maximum(
            jnp.dot(x.astype(w1c.dtype), w1c,
                    preferred_element_type=jnp.float32) + b1f, 0.0)
        return (jnp.dot(h.astype(w2c.dtype), w2c,
                        preferred_element_type=jnp.float32) + b2f).astype(x.dtype)
    return mlp_forward(x, w1c, b1f, w2c, b2f, block_b=block_b)


def init_params(key, in_dim=20, hidden_dim=256, out_dim=10, dtype=jnp.float32):
    # Deterministic init mirroring nn.Linear default (uniform +/- 1/sqrt(fan_in)).
    k1, k2, k3, k4 = jax.random.split(key, 4)
    bound1 = 1.0 / jnp.sqrt(in_dim)
    bound2 = 1.0 / jnp.sqrt(hidden_dim)
    w1 = jax.random.uniform(k1, (in_dim, hidden_dim), dtype, -bound1, bound1)
    b1 = jax.random.uniform(k2, (1, hidden_dim), dtype, -bound1, bound1)
    w2 = jax.random.uniform(k3, (hidden_dim, out_dim), dtype, -bound2, bound2)
    b2 = jax.random.uniform(k4, (1, out_dim), dtype, -bound2, bound2)
    return w1, b1, w2, b2


if __name__ == "__main__":
    key = jax.random.PRNGKey(0)
    kx, kp = jax.random.split(key)

    # X = torch.rand(2, 20)  ->  uniform [0, 1) of shape (2, 20)
    x = jax.random.uniform(kx, (2, 20), jnp.float32)
    w1, b1, w2, b2 = init_params(kp)

    # Weight prep happens once, outside the per-call path.
    w1c, b1f, w2c, b2f = prepare_params(w1, b1, w2, b2)

    out = mlp_forward(x, w1c, b1f, w2c, b2f)   # always exercise the Pallas path
    out = jax.block_until_ready(out)
    assert out.shape == (2, 10)

    # Reference 1: same bf16-operand / f32-accumulate math in pure JAX (tight check).
    cdt = jnp.bfloat16
    h_ref = jnp.maximum(
        jnp.dot(x.astype(cdt), w1.astype(cdt),
                preferred_element_type=jnp.float32) + b1, 0.0)
    ref_bf16 = jnp.dot(h_ref.astype(cdt), w2.astype(cdt),
                       preferred_element_type=jnp.float32) + b2
    assert jnp.allclose(out, ref_bf16, atol=1e-4, rtol=1e-4)

    # Reference 2: full f32 forward (loose sanity check on bf16 rounding error).
    ref_f32 = jnp.maximum(x @ w1 + b1, 0.0) @ w2 + b2
    assert jnp.allclose(out, ref_f32, atol=1e-1, rtol=1e-1)

    print("KERNEL_OK")
</pallas_src>

<mosaic_0001>
module attributes {stable_mosaic.version = 11 : i64} {
  func.func @mlp_kernel(%arg0: i32, %arg1: memref<2x20xbf16, #tpu.memory_space<vmem>>, %arg2: memref<20x256xbf16, #tpu.memory_space<vmem>>, %arg3: memref<1x256xf32, #tpu.memory_space<vmem>>, %arg4: memref<256x10xbf16, #tpu.memory_space<vmem>>, %arg5: memref<1x10xf32, #tpu.memory_space<vmem>>, %arg6: memref<2x10xf32, #tpu.memory_space<vmem>>) attributes {dimension_semantics = [#tpu.dimension_semantics<parallel>], iteration_bounds = array<i64: 1>, scalar_prefetch = 0 : i64, scratch_operands = 0 : i64, tpu.core_type = #tpu.core_type<tc>, window_params = [{transform_indices = @transform_0, window_bounds = array<i64: 2, 20>}, {pipeline_mode = #tpu.pipeline_mode<synchronous>, transform_indices = @transform_1, window_bounds = array<i64: 20, 256>}, {pipeline_mode = #tpu.pipeline_mode<synchronous>, transform_indices = @transform_2, window_bounds = array<i64: 1, 256>}, {pipeline_mode = #tpu.pipeline_mode<synchronous>, transform_indices = @transform_3, window_bounds = array<i64: 256, 10>}, {pipeline_mode = #tpu.pipeline_mode<synchronous>, transform_indices = @transform_4, window_bounds = array<i64: 1, 10>}, {transform_indices = @transform_5, window_bounds = array<i64: 2, 10>}]} {
    %c0 = arith.constant 0 : index
    %c0_0 = arith.constant 0 : index
    %0 = vector.load %arg1[%c0, %c0_0] : memref<2x20xbf16, #tpu.memory_space<vmem>>, vector<2x20xbf16>
    %c0_1 = arith.constant 0 : index
    %c0_2 = arith.constant 0 : index
    %1 = vector.load %arg2[%c0_1, %c0_2] : memref<20x256xbf16, #tpu.memory_space<vmem>>, vector<20x256xbf16>
    %cst = arith.constant dense<0.000000e+00> : vector<2x256xf32>
    %2 = tpu.matmul %0, %1, %cst {dimension_numbers = #tpu.dot_dimension_numbers<[1], [0], [0], [1], [0, 0, 1, 1], [], []>} : vector<2x20xbf16>, vector<20x256xbf16>, vector<2x256xf32> -> vector<2x256xf32>
    %c0_3 = arith.constant 0 : index
    %c0_4 = arith.constant 0 : index
    %3 = vector.load %arg3[%c0_3, %c0_4] : memref<1x256xf32, #tpu.memory_space<vmem>>, vector<1x256xf32>
    %4 = vector.broadcast %3 : vector<1x256xf32> to vector<2x256xf32>
    %5 = arith.addf %2, %4 : vector<2x256xf32>
    %cst_5 = arith.constant 0.000000e+00 : f32
    %6 = vector.broadcast %cst_5 : f32 to vector<2x256xf32>
    %7 = arith.maximumf %5, %6 : vector<2x256xf32>
    %8 = arith.truncf %7 : vector<2x256xf32> to vector<2x256xbf16>
    %c0_6 = arith.constant 0 : index
    %c0_7 = arith.constant 0 : index
    %9 = vector.load %arg4[%c0_6, %c0_7] : memref<256x10xbf16, #tpu.memory_space<vmem>>, vector<256x10xbf16>
    %cst_8 = arith.constant dense<0.000000e+00> : vector<2x10xf32>
    %10 = tpu.matmul %8, %9, %cst_8 {dimension_numbers = #tpu.dot_dimension_numbers<[1], [0], [0], [1], [0, 0, 1, 1], [], []>} : vector<2x256xbf16>, vector<256x10xbf16>, vector<2x10xf32> -> vector<2x10xf32>
    %c0_9 = arith.constant 0 : index
    %c0_10 = arith.constant 0 : index
    %11 = vector.load %arg5[%c0_9, %c0_10] : memref<1x10xf32, #tpu.memory_space<vmem>>, vector<1x10xf32>
    %12 = vector.broadcast %11 : vector<1x10xf32> to vector<2x10xf32>
    %13 = arith.addf %10, %12 : vector<2x10xf32>
    %c0_11 = arith.constant 0 : index
    %c0_12 = arith.constant 0 : index
    %14 = vector.load %arg6[%c0_11, %c0_12] : memref<2x10xf32, #tpu.memory_space<vmem>>, vector<2x10xf32>
    tpu.vector_store %arg6[%c0_11, %c0_12], %13 {strides = array<i32>} : memref<2x10xf32, #tpu.memory_space<vmem>>, vector<2x10xf32>,
    return
  }
  func.func @transform_0(%arg0: i32) -> (i32, i32) {
    %c0_i32 = arith.constant 0 : i32
    %c0_i32_0 = arith.constant 0 : i32
    return %arg0, %c0_i32 : i32, i32
  }
  func.func @transform_1(%arg0: i32) -> (i32, i32) {
    %c0_i32 = arith.constant 0 : i32
    %c0_i32_0 = arith.constant 0 : i32
    %c0_i32_1 = arith.constant 0 : i32
    return %c0_i32, %c0_i32_0 : i32, i32
  }
  func.func @transform_2(%arg0: i32) -> (i32, i32) {
    %c0_i32 = arith.constant 0 : i32
    %c0_i32_0 = arith.constant 0 : i32
    %c0_i32_1 = arith.constant 0 : i32
    return %c0_i32, %c0_i32_0 : i32, i32
  }
  func.func @transform_3(%arg0: i32) -> (i32, i32) {
    %c0_i32 = arith.constant 0 : i32
    %c0_i32_0 = arith.constant 0 : i32
    %c0_i32_1 = arith.constant 0 : i32
    return %c0_i32, %c0_i32_0 : i32, i32
  }
  func.func @transform_4(%arg0: i32) -> (i32, i32) {
    %c0_i32 = arith.constant 0 : i32
    %c0_i32_0 = arith.constant 0 : i32
    %c0_i32_1 = arith.constant 0 : i32
    return %c0_i32, %c0_i32_0 : i32, i32
  }
  func.func @transform_5(%arg0: i32) -> (i32, i32) {
    %c0_i32 = arith.constant 0 : i32
    %c0_i32_0 = arith.constant 0 : i32
    return %arg0, %c0_i32 : i32, i32
  }
}

</mosaic_0001>

<bundles_post_ra>
// kernel: tpu_custom_call.1
= control target key start
LH: loop header
LB: loop body
LE: loop exit
PB: predicated region body
PF: predicated region fallthrough
CT: control target
= control target key end

     0   :  { %vm57_vm0 = vcmask 1041408   ;;  %v390_v4 = vmov 0   ;;  %vm53_vm1 = vcmask 162816   ;;  %s491_s0 = inlined_call_operand.vmem [shape: bf16[2,20], index: 0, kind: input, shape index: {}]   ;;  %s492_s1 = inlined_call_operand.vmem [shape: bf16[20,256], index: 1, kind: input, shape index: {}]   ;;  %s493_s2 = inlined_call_operand.vmem [shape: f32[1,256], index: 2, kind: input, shape index: {}]   ;;  %s494_s3 = inlined_call_operand.vmem [shape: bf16[256,10], index: 3, kind: input, shape index: {}]   ;;  %s495_s4 = inlined_call_operand.vmem [shape: f32[1,10], index: 4, kind: input, shape index: {}]   ;;  %s496_s5 = inlined_call_operand.hbm [shape: f32[2,10], index: 5, kind: output, shape index: {}]  }
   0x1   :  { %v25_v0 = vld [vmem:[%s492_s1 + $0x10] sm:$0x33]  ;;  %v349_v3 = vld [vmem:[%s492_s1 + $0x4] ss:$8 sps:$4 sm:$0xff]   ;;  %96 = vmatprep.mubr.bf16.mxu0 %v390_v4  ;;  %v351_v5 = vld [vmem:[%s492_s1] ss:$8 sps:$4 sm:$0xff]  }
   0x2   :  { %v303_v1 = vcombine.high %v25_v0, %v25_v0  ;;  %v302_v2 = vcombine.low %v25_v0, %v25_v0  ;;  %v352_v6 = vld [vmem:[%s494_s3 + $0x78] sm:$0xff]   ;;  %v354_v9 = vld [vmem:[%s494_s3 + $0x70] sm:$0xff]   ;;  %v356_v11 = vld [vmem:[%s494_s3 + $0x68] sm:$0xff]  }
   0x3   :  { %v353_v8 = vld [vmem:[%s494_s3 + $0x38] sm:$0xff]   ;;  %323 = vmatprep.subr.bf16.mxu1 %v352_v6  ;;  %v355_v10 = vld [vmem:[%s494_s3 + $0x30] sm:$0xff]   ;;  %v22_v12 = vld [vmem:[%s491_s0] sm:$0x1] }
   0x4   :  { %304 = vmatprep.subr.msk.bf16.mxu0 %vm57_vm0, %v303_v1  ;;  %v59_v7 = vsel %vm57_vm0, %v302_v2, 0  ;;  %324 = vmatpush3.bf16.msra.mxu1 %v353_v8  ;;  %v357_v13 = vld [vmem:[%s494_s3 + $0x28] sm:$0xff]   ;;  %v358_v14 = vld [vmem:[%s494_s3 + $0x60] sm:$0xff]   ;;  %v360_v16 = vld [vmem:[%s494_s3 + $0x58] sm:$0xff]  }
   0x5   :  { %77 = vmatpush1.bf16.msra.mxu0 %v59_v7  ;;  %325 = vmatprep.subr.bf16.mxu1 %v354_v9  ;;  %v359_v15 = vld [vmem:[%s494_s3 + $0x20] sm:$0xff]   ;;  %v361_v17 = vld [vmem:[%s494_s3 + $0x18] sm:$0xff]  }
   0x6   :  { %78 = vmatprep.subr.bf16.mxu0 %v349_v3 }
   0x8   :  { %326 = vmatpush3.bf16.msra.mxu1 %v355_v10 }
   0x9   :  { %79 = vmatpush1.bf16.msra.mxu0 %v351_v5  ;;  %327 = vmatprep.subr.bf16.mxu1 %v356_v11 }
   0xc   :  { %305 = vmatmul.mubr.msk.bf16.vlgmr.msra.gmra.mxu0 %vm53_vm1, %v22_v12  ;;  %328 = vmatpush3.bf16.msra.mxu1 %v357_v13 }
   0xd   :  { %329 = vmatprep.subr.bf16.mxu1 %v358_v14 }
  0x10   :  { %330 = vmatpush3.bf16.msra.mxu1 %v359_v15 }
  0x11   :  { %10 = vsyncpa [#allocation3], 0  ;;  %331 = vmatprep.subr.bf16.mxu1 %v360_v16  ;;  %v362_v18 = vld [vmem:[%s494_s3 + $0x50] sm:$0xff]   ;;  %v364_v20 = vld [vmem:[%s494_s3 + $0x48] sm:$0xff]   ;;  %v28_v24 = vlaneseq  ;;  %vm284_vm2 = vcmask 74752  }
  0x12   :  { %v363_v19 = vld [vmem:[%s494_s3 + $0x10] sm:$0xff]   ;;  %v365_v21 = vld [vmem:[%s494_s3 + $0x8] sm:$0xff]   ;;  %v366_v22 = vld [vmem:[%s494_s3 + $0x40] sm:$0xff]  }
  0x13   :  { %v367_v23 = vld [vmem:[%s494_s3] sm:$0xff]   ;;  %v29_v25 = vshrl.u32 %v28_v24, 7 }
  0x14   :  { %332 = vmatpush3.bf16.msra.mxu1 %v361_v17  ;;  %v26_v27 = vld [vmem:[%s493_s2] sm:$0x3]  ;;  %s391_s2 = smov [#allocation2]  }
  0x15   :  { %333 = vmatprep.subr.bf16.mxu1 %v362_v18  ;;  %v30_v26 = vsub.s32 0, %v29_v25  ;;  %v34_v28 = vsub.s32 1, %v29_v25  ;;  %v306_v42 = vld [vmem:[%s495_s4] ss:$0 sm:$0xff]  ;;  %s292_s8 = sshll.u32 %s391_s2, 4  ;;  %s293_s8 = int_to_ptr.vmem [resolvable:$true] %s292_s8 }
  0x16   :  { %s368_s9 = scalar_lea.vmem %s293_s8, 32  ;;  %p373_p1 = scmp.lt.s32.totalorder %s293_s8, %s293_s8 }
  0x17   :  { %v31_v29 = vrot.slane %v26_v27, %v30_v26  ;;  %v35_v30 = vrot.slane %v26_v27, %v34_v28  ;;  %p369_p0 = scmp.ne.s32.totalorder %s293_s8, %s368_s9  ;;  %p374_p2 = scmp.lt.s32.totalorder %s368_s9, %s368_s9 }
  0x18   :  { %334 = vmatpush3.bf16.msra.mxu1 %v363_v19 }
  0x19   :  { %335 = vmatprep.subr.bf16.mxu1 %v364_v20  ;;  %p375_p3 = por %p374_p2, %p373_p1 }
  0x1b   :  { %p376_p4 = pnand %p375_p3, %p369_p0 }
  0x1c   :  { %336 = vmatpush3.bf16.msra.mxu1 %v365_v21 }
  0x1d   :  { %337 = vmatprep.subr.bf16.mxu1 %v366_v22 }
  0x20   :  { %338 = vmatpush3.bf16.msra.mxu1 %v367_v23 }
  0xcc   :  { %v98_v31 = vpop.f32.mrf.mxu0 }
  0xcd   :  { %v99_v32 = vadd.f32 %v98_v31, %v31_v29 }
  0xce   :  { %v100_v33 = vpop.f32.mrf.mxu0 }
  0xcf   :  { %v101_v34 = vadd.f32 %v100_v33, %v35_v30  ;;  %v105_v35 = vmax.f32 %v99_v32, 0.0 }
  0xd0   :  { %v102_v36 = vpop.f32.mrf.mxu0 }
  0xd1   :  { %v106_v37 = vmax.f32 %v101_v34, 0.0  ;;  %v107_v40 = vpack.c.bf16 %v105_v35, %v105_v35 }
  0xd2   :  { %v103_v38 = vpop.f32.mrf.mxu0 }
  0xd3   :  { %v108_v39 = vpack.c.bf16 %v106_v37, %v106_v37 }
  0xd5   :  { %276 = vmatprep.mubr.bf16.mxu1 %v108_v39 }
  0xd6   :  { %277 = vmatmul.mubr.bf16.vlgmr.msra.gmra.mxu1 %v107_v40 }
 0x196   :  { %v339_v41 = vpop.f32.mrf.mxu1 }
 0x198   :  { %v340_v43 = vpop.f32.mrf.mxu1 }
 0x199   :  { %v341_v44 = vadd.f32 %v340_v43, %v339_v41 }
 0x19a   :  { %v342_v45 = vpop.f32.mrf.mxu1 }
 0x19b   :  { %v279_v46 = vadd.f32 %v341_v44, %v306_v42 }
 0x19c   :  { %v343_v47 = vpop.f32.mrf.mxu1 }
 0x19d   :  { %285 = vst.msk [vmem:[#allocation2] sm:$0x3] %vm284_vm2, %v279_v46 }
 0x19e   :  { %379 = shalt.err (!%p376_p4)
}
 0x19f   :  { %295 = dma.vmem_to_hbm [thread:$0]  %s293_s8, 32, %s496_s5, [#allocation3]  }
 0x1a0   :  { %388 = dma.done.wait [#allocation3], 32  }
 0x1a1   :  { %389 = vsyncadd [#allocation3], 4294967264 }
 0x1a2   :  { %299 = vsyncpa [#allocation3], 1 }

</bundles_post_ra>
